<compile_context>
chip_gen: v6e
topology: v6e:2x2x1
jax: 0.10.0
libtpu: 0.0.40
codegen_flags: <defaults>
</compile_context>

<pallas_src>
import functools
import math

import jax
import jax.numpy as jnp
from jax.experimental import pallas as pl
from jax.experimental.pallas import tpu as pltpu

LANES = 128
BLOCK_ROWS = 8192            # (8192, 128) f32 = 4 MiB per input per grid step
VMEM_LIMIT_BYTES = 48 << 20  # 2 inputs x 2 buffers x 4 MiB = 16 MiB steady use;
                             # 48 MiB leaves slack and stays under v7x's 64 MiB.


def _num_tensorcores():
    """2 on v7x-family chips (2 TensorCores / chip), else 1 (v5e / v6e)."""
    # TODO(synk): verify on v7x (xprof) that dimension_semantics="parallel" on
    # the leading grid axis really shards across both TensorCores; if not,
    # switch that axis to pltpu.CORE_PARALLEL or drive it via pl.core_map.
    try:
        kind = jax.devices()[0].device_kind.lower()
    except Exception:
        return 1
    return 2 if "7" in kind else 1


def _huber_kernel(o_ref, t_ref, out_ref, acc_ref, *,
                  delta, rows, block_rows, steps, acc_rows, has_ragged):
    i = pl.program_id(1)

    @pl.when(i == 0)
    def _():
        acc_ref[...] = jnp.zeros_like(acc_ref)

    o = o_ref[...].astype(jnp.float32)
    t = t_ref[...].astype(jnp.float32)
    l1 = jnp.abs(o - t)                     # F.l1_loss(..., reduce=False)
    c = jnp.minimum(l1, delta)
    # c = l1    (l1 <  delta) -> 0.5 * l1**2           == 0.5 * mse
    # c = delta (l1 >= delta) -> delta * (l1 - delta/2)
    loss = c * (l1 - 0.5 * c)

    def accumulate(vals):
        # VPU-only partial accumulation into a few vreg-shaped accumulators.
        acc_ref[...] += vals.reshape(-1, acc_rows, LANES).sum(axis=0)

    if has_ragged:
        core = pl.program_id(0)
        block_idx = core * steps + i
        row_start = block_idx * block_rows
        needs_mask = row_start + block_rows > rows

        @pl.when(needs_mask)            # ragged tail block / clamped OOB block
        def _():
            row_ids = row_start + jax.lax.broadcasted_iota(
                jnp.int32, (block_rows, LANES), 0)
            accumulate(jnp.where(row_ids < rows, loss, 0.0))

        @pl.when(row_start + block_rows <= rows)   # steady state: no mask
        def _():
            accumulate(loss)
    else:
        accumulate(loss)

    @pl.when(i == steps - 1)
    def _():
        out_ref[...] = acc_ref[...].reshape(1, acc_rows, LANES)


def huber_loss(outputs, target, delta=5.0):
    """Pallas TPU Huber loss: scalar f32 == torch.mean(huber(outputs, target))."""
    assert outputs.shape == target.shape, (outputs.shape, target.shape)
    n_total = outputs.size
    itemsize = jnp.dtype(outputs.dtype).itemsize

    # Flatten in native dtype (kernel upcasts). Pad only to a 128-lane
    # multiple; padded zeros contribute exactly 0 to the Huber sum, and the
    # jnp.pad full copy only triggers when n_total % 128 != 0.
    o_flat = outputs.reshape(-1)
    t_flat = target.reshape(-1)
    pad = (-n_total) % LANES
    if pad:
        o_flat = jnp.pad(o_flat, (0, pad))
        t_flat = jnp.pad(t_flat, (0, pad))
    rows = (n_total + pad) // LANES
    o2 = o_flat.reshape(rows, LANES)
    t2 = t_flat.reshape(rows, LANES)

    # Block: full array if it fits in one block, else 8192 rows (a multiple of
    # 32, so the tiled block shape is valid for f32 / bf16 / int8 alike).
    block_rows = rows if rows <= BLOCK_ROWS else BLOCK_ROWS
    total_blocks = pl.cdiv(rows, block_rows)

    num_cores = _num_tensorcores()
    if total_blocks < num_cores:
        num_cores = 1
    steps = pl.cdiv(total_blocks, num_cores)
    # Does the (num_cores * steps) block grid overshoot the real row range?
    # If not, the in-kernel mask is compiled out entirely.
    has_ragged = (num_cores * steps * block_rows) != rows

    # Partial-sum accumulator width: up to 32 sublanes (4 vregs -> 4
    # independent VPU add chains).  For small / odd row counts fall back to a
    # whole-block accumulator (still tiny).
    acc_rows = math.gcd(block_rows, 32)
    if acc_rows < 8:
        acc_rows = block_rows

    def in_map(core, i):
        b = core * steps + i
        # Clamp fully-out-of-range tail blocks to a valid block; their
        # contribution is zeroed by the in-kernel row mask.
        return (jnp.minimum(b, total_blocks - 1), 0)

    kernel = functools.partial(
        _huber_kernel, delta=float(delta), rows=rows, block_rows=block_rows,
        steps=steps, acc_rows=acc_rows, has_ragged=has_ragged)

    cost = pl.CostEstimate(
        flops=7 * n_total,
        transcendentals=0,
        bytes_accessed=2 * n_total * itemsize)

    partial = pl.pallas_call(
        kernel,
        out_shape=jax.ShapeDtypeStruct((num_cores, acc_rows, LANES),
                                       jnp.float32),
        grid_spec=pltpu.PrefetchScalarGridSpec(
            num_scalar_prefetch=0,
            grid=(num_cores, steps),
            in_specs=[
                pl.BlockSpec((block_rows, LANES), in_map),
                pl.BlockSpec((block_rows, LANES), in_map),
            ],
            out_specs=pl.BlockSpec((1, acc_rows, LANES),
                                   lambda core, i: (core, 0, 0)),
            scratch_shapes=[pltpu.VMEM((acc_rows, LANES), jnp.float32)],
        ),
        compiler_params=pltpu.CompilerParams(
            dimension_semantics=("parallel", "arbitrary"),
            vmem_limit_bytes=VMEM_LIMIT_BYTES),
        cost_estimate=cost,
    )(o2, t2)

    # Tiny one-off cross-lane reduce + mean done in XLA.
    return jnp.sum(partial) / n_total


def huber_ref(outputs, target, delta=5.0):
    diff = outputs.astype(jnp.float32) - target.astype(jnp.float32)
    l1 = jnp.abs(diff)
    mse = diff * diff
    mask = (l1 < delta).astype(jnp.float32)
    loss = 0.5 * mse * mask + delta * (l1 - 0.5 * delta) * (1.0 - mask)
    return jnp.mean(loss)


if __name__ == "__main__":
    key = jax.random.PRNGKey(0)
    k1, k2 = jax.random.split(key)

    # NCHW inputs scaled so both Huber branches (|o-t| < 5 and >= 5) are hit.
    x = jax.random.normal(k1, (2, 4, 16, 16), dtype=jnp.float32) * 6.0
    y = jax.random.normal(k2, (2, 4, 16, 16), dtype=jnp.float32) * 6.0
    result = jax.block_until_ready(huber_loss(x, y, delta=5.0))
    expected = jax.block_until_ready(huber_ref(x, y, delta=5.0))
    assert jnp.allclose(result, expected, rtol=1e-5, atol=1e-5), (result, expected)

    # Ragged bf16 path: pads to a 128 multiple, block == full array.
    xb = (jax.random.normal(k1, (3, 5, 17, 31)) * 6.0).astype(jnp.bfloat16)
    yb = (jax.random.normal(k2, (3, 5, 17, 31)) * 6.0).astype(jnp.bfloat16)
    rb = jax.block_until_ready(huber_loss(xb, yb, delta=5.0))
    eb = jax.block_until_ready(huber_ref(xb, yb, delta=5.0))
    assert jnp.allclose(rb, eb, rtol=1e-3, atol=1e-3), (rb, eb)

    # Multi-block path (> 8192 rows): ragged final block takes the masked
    # branch, steady-state blocks take the unmasked branch.
    xm = jax.random.normal(k1, (2, 2, 288, 1024), dtype=jnp.float32) * 6.0
    ym = jax.random.normal(k2, (2, 2, 288, 1024), dtype=jnp.float32) * 6.0
    rm = jax.block_until_ready(huber_loss(xm, ym, delta=5.0))
    em = jax.block_until_ready(huber_ref(xm, ym, delta=5.0))
    assert jnp.allclose(rm, em, rtol=1e-4, atol=1e-5), (rm, em)

    print("KERNEL_OK")
</pallas_src>

<mosaic_0001>
module attributes {stable_mosaic.version = 11 : i64} {
  func.func @_huber_kernel(%arg0: i32, %arg1: i32, %arg2: memref<16x128xf32, #tpu.memory_space<vmem>>, %arg3: memref<16x128xf32, #tpu.memory_space<vmem>>, %arg4: memref<1x16x128xf32, #tpu.memory_space<vmem>>, %arg5: memref<16x128xf32, #tpu.memory_space<vmem>>) attributes {dimension_semantics = [#tpu.dimension_semantics<parallel>, #tpu.dimension_semantics<arbitrary>], iteration_bounds = array<i64: 1, 1>, scalar_prefetch = 0 : i64, scratch_operands = 1 : i64, tpu.core_type = #tpu.core_type<tc>, window_params = [{transform_indices = @transform_0, window_bounds = array<i64: 16, 128>}, {transform_indices = @transform_1, window_bounds = array<i64: 16, 128>}, {transform_indices = @transform_2, window_bounds = array<i64: 1, 16, 128>}]} {
    %c0_i32 = arith.constant 0 : i32
    %0 = arith.cmpi eq, %arg1, %c0_i32 : i32
    %1 = arith.extui %0 : i1 to i32
    %c0_i32_0 = arith.constant 0 : i32
    %2 = arith.cmpi ne, %1, %c0_i32_0 : i32
    scf.if %2 {
      %cst_12 = arith.constant 0.000000e+00 : f32
      %21 = vector.broadcast %cst_12 : f32 to vector<16x128xf32>
      %c0_13 = arith.constant 0 : index
      %c0_14 = arith.constant 0 : index
      %22 = vector.load %arg5[%c0_13, %c0_14] : memref<16x128xf32, #tpu.memory_space<vmem>>, vector<16x128xf32>
      tpu.vector_store %arg5[%c0_13, %c0_14], %21 {strides = array<i32>} : memref<16x128xf32, #tpu.memory_space<vmem>>, vector<16x128xf32>,
    } else {
    }
    %c0 = arith.constant 0 : index
    %c0_1 = arith.constant 0 : index
    %3 = vector.load %arg2[%c0, %c0_1] : memref<16x128xf32, #tpu.memory_space<vmem>>, vector<16x128xf32>
    %c0_2 = arith.constant 0 : index
    %c0_3 = arith.constant 0 : index
    %4 = vector.load %arg3[%c0_2, %c0_3] : memref<16x128xf32, #tpu.memory_space<vmem>>, vector<16x128xf32>
    %5 = arith.subf %3, %4 : vector<16x128xf32>
    %6 = math.absf %5 : vector<16x128xf32>
    %cst = arith.constant 5.000000e+00 : f32
    %7 = vector.broadcast %cst : f32 to vector<16x128xf32>
    %8 = arith.minimumf %6, %7 : vector<16x128xf32>
    %cst_4 = arith.constant 5.000000e-01 : f32
    %9 = vector.broadcast %cst_4 : f32 to vector<16x128xf32>
    %10 = arith.mulf %9, %8 : vector<16x128xf32>
    %11 = arith.subf %6, %10 : vector<16x128xf32>
    %12 = arith.mulf %8, %11 : vector<16x128xf32>
    %c0_5 = arith.constant 0 : index
    %c0_6 = arith.constant 0 : index
    %13 = vector.load %arg5[%c0_5, %c0_6] : memref<16x128xf32, #tpu.memory_space<vmem>>, vector<16x128xf32>
    %14 = vector.shape_cast %12 : vector<16x128xf32> to vector<1x16x128xf32>
    %cst_7 = arith.constant dense<0.000000e+00> : vector<16x128xf32>
    %15 = vector.multi_reduction <add>, %14, %cst_7 [0] : vector<1x16x128xf32> to vector<16x128xf32>
    %16 = arith.addf %13, %15 : vector<16x128xf32>
    %c0_8 = arith.constant 0 : index
    %c0_9 = arith.constant 0 : index
    %17 = vector.load %arg5[%c0_8, %c0_9] : memref<16x128xf32, #tpu.memory_space<vmem>>, vector<16x128xf32>
    tpu.vector_store %arg5[%c0_8, %c0_9], %16 {strides = array<i32>} : memref<16x128xf32, #tpu.memory_space<vmem>>, vector<16x128xf32>,
    %c0_i32_10 = arith.constant 0 : i32
    %18 = arith.cmpi eq, %arg1, %c0_i32_10 : i32
    %19 = arith.extui %18 : i1 to i32
    %c0_i32_11 = arith.constant 0 : i32
    %20 = arith.cmpi ne, %19, %c0_i32_11 : i32
    scf.if %20 {
      %c0_12 = arith.constant 0 : index
      %c0_13 = arith.constant 0 : index
      %21 = vector.load %arg5[%c0_12, %c0_13] : memref<16x128xf32, #tpu.memory_space<vmem>>, vector<16x128xf32>
      %22 = vector.shape_cast %21 : vector<16x128xf32> to vector<1x16x128xf32>
      %c0_14 = arith.constant 0 : index
      %c0_15 = arith.constant 0 : index
      %c0_16 = arith.constant 0 : index
      %23 = vector.load %arg4[%c0_14, %c0_15, %c0_16] : memref<1x16x128xf32, #tpu.memory_space<vmem>>, vector<1x16x128xf32>
      tpu.vector_store %arg4[%c0_14, %c0_15, %c0_16], %22 {strides = array<i32>} : memref<1x16x128xf32, #tpu.memory_space<vmem>>, vector<1x16x128xf32>,
    } else {
    }
    return
  }
  func.func @transform_0(%arg0: i32, %arg1: i32) -> (i32, i32) {
    %c1_i32 = arith.constant 1 : i32
    %0 = arith.muli %arg0, %c1_i32 : i32
    %1 = arith.addi %0, %arg1 : i32
    %c0_i32 = arith.constant 0 : i32
    %2 = arith.minsi %1, %c0_i32 : i32
    %c0_i32_0 = arith.constant 0 : i32
    %c0_i32_1 = arith.constant 0 : i32
    return %2, %c0_i32_0 : i32, i32
  }
  func.func @transform_1(%arg0: i32, %arg1: i32) -> (i32, i32) {
    %c1_i32 = arith.constant 1 : i32
    %0 = arith.muli %arg0, %c1_i32 : i32
    %1 = arith.addi %0, %arg1 : i32
    %c0_i32 = arith.constant 0 : i32
    %2 = arith.minsi %1, %c0_i32 : i32
    %c0_i32_0 = arith.constant 0 : i32
    %c0_i32_1 = arith.constant 0 : i32
    return %2, %c0_i32_0 : i32, i32
  }
  func.func @transform_2(%arg0: i32, %arg1: i32) -> (i32, i32, i32) {
    %c0_i32 = arith.constant 0 : i32
    %c0_i32_0 = arith.constant 0 : i32
    %c0_i32_1 = arith.constant 0 : i32
    return %arg0, %c0_i32, %c0_i32_0 : i32, i32, i32
  }
}

</mosaic_0001>

<bundles_post_ra>
// kernel: tpu_custom_call.1
= control target key start
LH: loop header
LB: loop body
LE: loop exit
PB: predicated region body
PF: predicated region fallthrough
CT: control target
= control target key end

     0   :  { %7 = vsyncpa [#allocation4], 0  ;;  %s228_s0 = inlined_call_operand.hbm [shape: f32[16,128], index: 0, kind: input, shape index: {}]   ;;  %s229_s1 = inlined_call_operand.hbm [shape: f32[16,128], index: 1, kind: input, shape index: {}]   ;;  %s230_s2 = inlined_call_operand.hbm [shape: f32[1,16,128], index: 2, kind: output, shape index: {}]  }
   0x1   :  { %8 = vsyncpa [#allocation7], 0 }
   0x2   :  { %9 = vsyncpa [#allocation5], 0  ;;  %s190_s9 = smov [#allocation3]  }
   0x3   :  { %s21_s10 = sshll.u32 %s190_s9, 4  ;;  %s22_s10 = int_to_ptr.vmem [resolvable:$true] %s21_s10 }
   0x4   :  { %s132_s11 = scalar_lea.vmem %s22_s10, 256  ;;  %p137_p1 = scmp.lt.s32.totalorder %s22_s10, %s22_s10 }
   0x5   :  { %p133_p0 = scmp.ne.s32.totalorder %s22_s10, %s132_s11  ;;  %p138_p2 = scmp.lt.s32.totalorder %s132_s11, %s132_s11 }
   0x7   :  { %p139_p3 = por %p138_p2, %p137_p1 }
   0x9   :  { %p140_p4 = pnand %p139_p3, %p133_p0 }
   0xb   :  { %143 = shalt.err (!%p140_p4)
}
   0xc   :  { %s191_s12 = smov 128   ;;  %s192_s13 = smov 8  }
   0xd   :  { %27 = dma.hbm_to_vmem [thread:$0]  %s228_s0, 256, %s22_s10, [#allocation4], %s191_s12, %s191_s12, %s192_s13  }
   0xe   :  { %s193_s16 = smov [#allocation6]  }
   0xf   :  { %s39_s17 = sshll.u32 %s193_s16, 4  ;;  %s40_s17 = int_to_ptr.vmem [resolvable:$true] %s39_s17 }
  0x10   :  { %s152_s18 = scalar_lea.vmem %s40_s17, 256  ;;  %p157_p6 = scmp.lt.s32.totalorder %s40_s17, %s40_s17 }
  0x11   :  { %p153_p5 = scmp.ne.s32.totalorder %s40_s17, %s152_s18  ;;  %p158_p7 = scmp.lt.s32.totalorder %s152_s18, %s152_s18 }
  0x13   :  { %p159_p8 = por %p158_p7, %p157_p6 }
  0x15   :  { %p160_p9 = pnand %p159_p8, %p153_p5 }
  0x17   :  { %163 = shalt.err (!%p160_p9)
}
  0x18   :  { %45 = dma.hbm_to_vmem [thread:$0]  %s229_s1, 256, %s40_s17, [#allocation7], %s191_s12, %s191_s12, %s192_s13  }
  0x19   :  { %184 = dma.done.wait [#allocation4], 256  }
  0x1a   :  { %185 = vsyncadd [#allocation4], 4294967040 }
  0x1b   :  { %186 = dma.done.wait [#allocation7], 256  }
  0x1c   :  { %187 = vsyncadd [#allocation7], 4294967040  ;;  %v66_v0 = vld [vmem:[#allocation3] sm:$0xff]  ;;  %v68_v1 = vld [vmem:[#allocation6] sm:$0xff]  ;;  %s194_s0 = smov [#allocation8]  }
  0x1d   :  { %v67_v2 = vld [vmem:[#allocation3 + $0x8] sm:$0xff]  ;;  %v70_v3 = vsub.f32 %v66_v0, %v68_v1  ;;  %v69_v4 = vld [vmem:[#allocation6 + $0x8] sm:$0xff]  ;;  %s102_s21 = sshll.u32 %s194_s0, 4  ;;  %s103_s21 = int_to_ptr.vmem [resolvable:$true] %s102_s21 }
  0x1e   :  { %v71_v5 = vsub.f32 %v67_v2, %v69_v4  ;;  %s164_s1 = scalar_lea.vmem %s103_s21, 256  ;;  %p169_p11 = scmp.lt.s32.totalorder %s103_s21, %s103_s21 }
  0x1f   :  { %v72_v6 = vand.u32 2147483647, %v70_v3  ;;  %p165_p10 = scmp.ne.s32.totalorder %s103_s21, %s164_s1  ;;  %p170_p12 = scmp.lt.s32.totalorder %s164_s1, %s164_s1 }
  0x20   :  { %v73_v7 = vand.u32 2147483647, %v71_v5 }
  0x21   :  { %v74_v8 = vmin.f32 %v72_v6, 5.0  ;;  %p171_p13 = por %p170_p12, %p169_p11 }
  0x22   :  { %v75_v9 = vmin.f32 %v73_v7, 5.0 }
  0x23   :  { %v76_v10 = vmul.f32 0.5, %v74_v8  ;;  %p172_p0 = pnand %p171_p13, %p165_p10 }
  0x24   :  { %v77_v11 = vmul.f32 0.5, %v75_v9 }
  0x25   :  { %v78_v12 = vsub.f32 %v72_v6, %v76_v10 }
  0x26   :  { %v79_v13 = vsub.f32 %v73_v7, %v77_v11 }
  0x27   :  { %v80_v14 = vmul.f32 %v78_v12, %v74_v8 }
  0x28   :  { %v81_v15 = vmul.f32 %v79_v13, %v75_v9 }
  0x29   :  { %95 = vst [vmem:[#allocation8] sm:$0xff] %v80_v14 }
  0x2a   :  { %96 = vst [vmem:[#allocation8 + $0x8] sm:$0xff] %v81_v15 }
  0x2b   :  { %175 = shalt.err (!%p172_p0)
}
  0x2c   :  { %108 = dma.vmem_to_hbm [thread:$0]  %s103_s21, 256, %s230_s2, [#allocation5], %s191_s12, %s191_s12, %s192_s13  }
  0x2d   :  { %188 = dma.done.wait [#allocation5], 256  }
  0x2e   :  { %189 = vsyncadd [#allocation5], 4294967040 }
  0x2f   :  { %112 = vsyncpa [#allocation4], 1 }
  0x30   :  { %113 = vsyncpa [#allocation7], 1 }
  0x31   :  { %114 = vsyncpa [#allocation5], 1 }

</bundles_post_ra>
